<compile_context>
chip_gen: v7x
topology: tpu7x:2x2x1
jax: 0.10.0
libtpu: 0.0.40
codegen_flags: <defaults>
</compile_context>

<pallas_src>
import functools

import jax
import jax.numpy as jnp
from jax.experimental import pallas as pl
from jax.experimental.pallas import tpu as pltpu


LANES = 128
BLOCK_IN_BYTES = 2 * 1024 * 1024      # HBM bytes per input per grid step
NSPLITS = 2                           # leading "parallel" axis (v7x megacore)
VMEM_LIMIT_BYTES = 48 * 1024 * 1024   # safe on v5e/v6e (128 MiB) and v7x (64 MiB)


def _canber_kernel(x_ref, t_ref, o_ref, *, rows, block_rows, blocks_per_split,
                   num_blocks, has_tail, has_replay):
    c = pl.program_id(0)              # reduction split (megacore axis)
    i = pl.program_id(1)              # block step within the split
    g = c * blocks_per_split + i      # logical (unclamped) block index

    @pl.when(i == 0)
    def _init():
        o_ref[...] = jnp.zeros_like(o_ref)

    def _accumulate(vals):
        # (block_rows, 128) -> (8, 128): whole-vreg groups summed on the VPU.
        o_ref[0] += jnp.sum(vals.reshape(block_rows // 8, 8, LANES), axis=0)

    def _compute():
        x = x_ref[...].astype(jnp.float32)
        t = t_ref[...].astype(jnp.float32)
        s = x + t
        # |x-t| / (x+t): EUP approx reciprocal + 2 Newton-Raphson steps
        # (f32-accurate regardless of the HW approximation precision).
        r = pl.reciprocal(s, approx=True)
        r = r * (2.0 - s * r)
        r = r * (2.0 - s * r)
        d = jnp.abs(x - t) * r

        if not has_tail:
            _accumulate(d)
        else:
            is_tail = g == num_blocks - 1   # only block that can hold pad rows

            @pl.when(jnp.logical_not(is_tail))
            def _fast():
                _accumulate(d)

            @pl.when(is_tail)
            def _masked():
                row_ids = g * block_rows + jax.lax.broadcasted_iota(
                    jnp.int32, (block_rows, 1), 0)
                # where() also squashes NaN/Inf from padded garbage rows.
                _accumulate(jnp.where(row_ids < rows, d, 0.0))

    if has_replay:
        # Replayed round-up steps (g >= num_blocks) do zero VPU work; their
        # clamped block index (see in_map) already avoids a re-DMA.
        pl.when(g < num_blocks)(_compute)
    else:
        _compute()


def canber_loss(inp, tgt):
    """Pallas TPU implementation of CanberLoss(reduction='batchmean')."""
    assert inp.shape == tgt.shape
    assert inp.ndim >= 2, "needs a dim=1 to sum over"

    total = 1
    for s in inp.shape:
        total *= s
    denom = total // inp.shape[1]     # numel / C  (mean over all dims but 1)

    itemsize = jnp.dtype(inp.dtype).itemsize
    max_block_rows = max(16, BLOCK_IN_BYTES // (LANES * itemsize))

    rows0 = -(-total // LANES)        # cdiv(total, LANES)
    if rows0 >= max_block_rows:
        # Large input: lane-align only; the (at most one) partial tail block
        # is masked in-kernel.
        block_rows = max_block_rows
        rows = rows0
    else:
        # Small input: pad up to one full (16-row aligned) block of ones so
        # the kernel takes the simplest mask-free single-block path.
        block_rows = ((rows0 + 15) // 16) * 16
        rows = block_rows
    pad = rows * LANES - total

    x = inp.reshape(-1)
    t = tgt.reshape(-1)
    if pad:
        # ones-pad: |1-1|/(1+1) == 0 contribution.
        ones = jnp.ones((pad,), inp.dtype)
        x = jnp.concatenate([x, ones])
        t = jnp.concatenate([t, ones])
    x2 = x.reshape(rows, LANES)
    t2 = t.reshape(rows, LANES)

    num_blocks = pl.cdiv(rows, block_rows)
    nsplits = min(NSPLITS, num_blocks)
    blocks_per_split = pl.cdiv(num_blocks, nsplits)
    has_tail = (rows % block_rows) != 0
    has_replay = nsplits * blocks_per_split > num_blocks

    def in_map(c, i):
        g = c * blocks_per_split + i
        # Clamp so replayed steps re-target the previous (already resident)
        # block -> no extra DMA; the kernel skips their compute via pl.when.
        return (jnp.minimum(g, num_blocks - 1), 0)

    kernel = functools.partial(
        _canber_kernel,
        rows=rows,
        block_rows=block_rows,
        blocks_per_split=blocks_per_split,
        num_blocks=num_blocks,
        has_tail=has_tail,
        has_replay=has_replay,
    )

    partials = pl.pallas_call(
        kernel,
        out_shape=jax.ShapeDtypeStruct((nsplits, 8, LANES), jnp.float32),
        grid_spec=pltpu.PrefetchScalarGridSpec(
            num_scalar_prefetch=0,
            grid=(nsplits, blocks_per_split),
            in_specs=[
                pl.BlockSpec((block_rows, LANES), in_map),
                pl.BlockSpec((block_rows, LANES), in_map),
            ],
            out_specs=pl.BlockSpec((1, 8, LANES), lambda c, i: (c, 0, 0)),
        ),
        compiler_params=pltpu.CompilerParams(
            # On v7x, if profiling shows a single TC active, switch the
            # leading axis to pltpu.CORE_PARALLEL.
            dimension_semantics=("parallel", "arbitrary"),
            vmem_limit_bytes=VMEM_LIMIT_BYTES,
        ),
    )(x2, t2)

    return jnp.sum(partials) / jnp.float32(denom)


def _reference(x, t):
    return jnp.mean(jnp.sum(jnp.abs(x - t) / (x + t), axis=1))


if __name__ == "__main__":
    key = jax.random.PRNGKey(0)
    keys = jax.random.split(key, 6)

    # 1) Small, module-consistent shape: single block, mask-free fast path.
    B, C, H, W = 2, 4, 16, 16
    x = jax.random.uniform(keys[0], (B, C, H, W), jnp.float32, minval=0.1, maxval=1.0)
    t = jax.random.uniform(keys[1], (B, C, H, W), jnp.float32, minval=0.1, maxval=1.0)
    out = jax.block_until_ready(canber_loss(x, t))
    ref = _reference(x, t)
    assert jnp.allclose(out, ref, rtol=1e-5, atol=1e-5), (out, ref)

    # 2) Multi-block: rows=9600 -> 3 blocks of 4096, 2 splits, one replayed
    #    (skipped) step and one masked tail block.
    B2, C2, H2, W2 = 4, 8, 300, 128
    x2 = jax.random.uniform(keys[2], (B2, C2, H2, W2), jnp.float32, minval=0.1, maxval=1.0)
    t2 = jax.random.uniform(keys[3], (B2, C2, H2, W2), jnp.float32, minval=0.1, maxval=1.0)
    out2 = jax.block_until_ready(canber_loss(x2, t2))
    ref2 = _reference(x2, t2)
    assert jnp.allclose(out2, ref2, rtol=2e-5, atol=2e-5), (out2, ref2)

    # 3) Lane-unaligned element count (462 elements): exercises the ones-pad.
    B3, C3, H3, W3 = 2, 3, 7, 11
    x3 = jax.random.uniform(keys[4], (B3, C3, H3, W3), jnp.float32, minval=0.1, maxval=1.0)
    t3 = jax.random.uniform(keys[5], (B3, C3, H3, W3), jnp.float32, minval=0.1, maxval=1.0)
    out3 = jax.block_until_ready(canber_loss(x3, t3))
    ref3 = _reference(x3, t3)
    assert jnp.allclose(out3, ref3, rtol=1e-5, atol=1e-5), (out3, ref3)

    print("KERNEL_OK")
</pallas_src>

<mosaic_0001>
module attributes {stable_mosaic.version = 11 : i64} {
  func.func @_canber_kernel(%arg0: i32, %arg1: i32, %arg2: memref<16x128xf32, #tpu.memory_space<vmem>>, %arg3: memref<16x128xf32, #tpu.memory_space<vmem>>, %arg4: memref<1x8x128xf32, #tpu.memory_space<vmem>>) attributes {dimension_semantics = [#tpu.dimension_semantics<parallel>, #tpu.dimension_semantics<arbitrary>], iteration_bounds = array<i64: 1, 1>, scalar_prefetch = 0 : i64, scratch_operands = 0 : i64, tpu.core_type = #tpu.core_type<tc>, window_params = [{transform_indices = @transform_0, window_bounds = array<i64: 16, 128>}, {transform_indices = @transform_1, window_bounds = array<i64: 16, 128>}, {transform_indices = @transform_2, window_bounds = array<i64: 1, 8, 128>}]} {
    %c0_i32 = arith.constant 0 : i32
    %0 = arith.cmpi eq, %arg1, %c0_i32 : i32
    %1 = arith.extui %0 : i1 to i32
    %c0_i32_0 = arith.constant 0 : i32
    %2 = arith.cmpi ne, %1, %c0_i32_0 : i32
    scf.if %2 {
      %cst_12 = arith.constant 0.000000e+00 : f32
      %26 = vector.broadcast %cst_12 : f32 to vector<1x8x128xf32>
      %c0_13 = arith.constant 0 : index
      %c0_14 = arith.constant 0 : index
      %c0_15 = arith.constant 0 : index
      %27 = vector.load %arg4[%c0_13, %c0_14, %c0_15] : memref<1x8x128xf32, #tpu.memory_space<vmem>>, vector<1x8x128xf32>
      tpu.vector_store %arg4[%c0_13, %c0_14, %c0_15], %26 {strides = array<i32>} : memref<1x8x128xf32, #tpu.memory_space<vmem>>, vector<1x8x128xf32>,
    } else {
    }
    %c0 = arith.constant 0 : index
    %c0_1 = arith.constant 0 : index
    %3 = vector.load %arg2[%c0, %c0_1] : memref<16x128xf32, #tpu.memory_space<vmem>>, vector<16x128xf32>
    %c0_2 = arith.constant 0 : index
    %c0_3 = arith.constant 0 : index
    %4 = vector.load %arg3[%c0_2, %c0_3] : memref<16x128xf32, #tpu.memory_space<vmem>>, vector<16x128xf32>
    %5 = arith.addf %3, %4 : vector<16x128xf32>
    %6 = tpu.reciprocal %5 {approx = true} : vector<16x128xf32> -> vector<16x128xf32>
    %7 = arith.mulf %5, %6 : vector<16x128xf32>
    %cst = arith.constant 2.000000e+00 : f32
    %8 = vector.broadcast %cst : f32 to vector<16x128xf32>
    %9 = arith.subf %8, %7 : vector<16x128xf32>
    %10 = arith.mulf %6, %9 : vector<16x128xf32>
    %11 = arith.mulf %5, %10 : vector<16x128xf32>
    %cst_4 = arith.constant 2.000000e+00 : f32
    %12 = vector.broadcast %cst_4 : f32 to vector<16x128xf32>
    %13 = arith.subf %12, %11 : vector<16x128xf32>
    %14 = arith.mulf %10, %13 : vector<16x128xf32>
    %15 = arith.subf %3, %4 : vector<16x128xf32>
    %16 = math.absf %15 : vector<16x128xf32>
    %17 = arith.mulf %16, %14 : vector<16x128xf32>
    %c0_5 = arith.constant 0 : index
    %c0_6 = arith.constant 0 : index
    %c0_7 = arith.constant 0 : index
    %18 = vector.load %arg4[%c0_5, %c0_6, %c0_7] : memref<1x8x128xf32, #tpu.memory_space<vmem>>, vector<1x8x128xf32>
    %19 = vector.shape_cast %18 : vector<1x8x128xf32> to vector<8x128xf32>
    %20 = vector.shape_cast %17 : vector<16x128xf32> to vector<2x8x128xf32>
    %cst_8 = arith.constant dense<0.000000e+00> : vector<8x128xf32>
    %21 = vector.multi_reduction <add>, %20, %cst_8 [0] : vector<2x8x128xf32> to vector<8x128xf32>
    %22 = arith.addf %19, %21 : vector<8x128xf32>
    %c0_9 = arith.constant 0 : index
    %c0_10 = arith.constant 0 : index
    %c0_11 = arith.constant 0 : index
    %23 = vector.load %arg4[%c0_9, %c0_10, %c0_11] : memref<1x8x128xf32, #tpu.memory_space<vmem>>, vector<1x8x128xf32>
    %24 = vector.shape_cast %23 : vector<1x8x128xf32> to vector<8x128xf32>
    %25 = vector.shape_cast %22 : vector<8x128xf32> to vector<1x8x128xf32>
    tpu.vector_store %arg4[%c0_9, %c0_10, %c0_11], %25 {strides = array<i32>} : memref<1x8x128xf32, #tpu.memory_space<vmem>>, vector<1x8x128xf32>,
    return
  }
  func.func @transform_0(%arg0: i32, %arg1: i32) -> (i32, i32) {
    %c1_i32 = arith.constant 1 : i32
    %0 = arith.muli %arg0, %c1_i32 : i32
    %1 = arith.addi %0, %arg1 : i32
    %c0_i32 = arith.constant 0 : i32
    %2 = arith.minsi %1, %c0_i32 : i32
    %c0_i32_0 = arith.constant 0 : i32
    %c0_i32_1 = arith.constant 0 : i32
    return %2, %c0_i32_0 : i32, i32
  }
  func.func @transform_1(%arg0: i32, %arg1: i32) -> (i32, i32) {
    %c1_i32 = arith.constant 1 : i32
    %0 = arith.muli %arg0, %c1_i32 : i32
    %1 = arith.addi %0, %arg1 : i32
    %c0_i32 = arith.constant 0 : i32
    %2 = arith.minsi %1, %c0_i32 : i32
    %c0_i32_0 = arith.constant 0 : i32
    %c0_i32_1 = arith.constant 0 : i32
    return %2, %c0_i32_0 : i32, i32
  }
  func.func @transform_2(%arg0: i32, %arg1: i32) -> (i32, i32, i32) {
    %c0_i32 = arith.constant 0 : i32
    %c0_i32_0 = arith.constant 0 : i32
    %c0_i32_1 = arith.constant 0 : i32
    return %arg0, %c0_i32, %c0_i32_0 : i32, i32, i32
  }
}

</mosaic_0001>

<bundles_post_ra>
// kernel: tpu_custom_call.1
= control target key start
LH: loop header
LB: loop body
LE: loop exit
PB: predicated region body
PF: predicated region fallthrough
CT: control target
= control target key end

     0   :  { %7 = vsyncpa [#allocation3], 0  ;;  %s253_s0 = inlined_call_operand.hbm [shape: f32[16,128], index: 0, kind: input, shape index: {}]   ;;  %s254_s1 = inlined_call_operand.hbm [shape: f32[16,128], index: 1, kind: input, shape index: {}]   ;;  %s255_s2 = inlined_call_operand.hbm [shape: f32[1,8,128], index: 2, kind: output, shape index: {}]  }
   0x1   :  { %8 = vsyncpa [#allocation6], 0 }
   0x2   :  { %9 = vsyncpa [#allocation4], 0  ;;  %s197_s9 = smov [#allocation2]   ;;  %s125_s13 = scalar_lea.hbm %s253_s0, 256 }
   0x3   :  { %s21_s10 = sshll.u32 %s197_s9, 4  ;;  %p126_p0 = scmp.ne.s32.totalorder %s253_s0, %s125_s13  ;;  %s22_s10 = int_to_ptr.vmem [resolvable:$true] %s21_s10 }
   0x4   :  { %p129_p1 = scmp.lt.u32.totalorder %s125_s13, %s253_s0 }
   0x6   :  { %p131_p2 = pnand %p129_p1, %p126_p0 }
   0x8   :  { %134 = shalt.err (!%p131_p2)
}
   0x9   :  { %s135_s18 = scalar_lea.vmem %s22_s10, 256  ;;  %p140_p4 = scmp.lt.s32.totalorder %s22_s10, %s22_s10 }
   0xa   :  { %p136_p3 = scmp.ne.s32.totalorder %s22_s10, %s135_s18  ;;  %p141_p5 = scmp.lt.s32.totalorder %s135_s18, %s135_s18 }
   0xc   :  { %p142_p6 = por %p141_p5, %p140_p4 }
   0xe   :  { %p143_p7 = pnand %p142_p6, %p136_p3 }
  0x10   :  { %146 = shalt.err (!%p143_p7)
}
  0x11   :  { %s198_s19 = smov 128   ;;  %s199_s20 = smov 8  }
  0x12   :  { %27 = dma.hbm_to_vmem [thread:$0]  %s253_s0, 256, %s22_s10, [#allocation3], %s198_s19, %s198_s19, %s199_s20  }
  0x13   :  { %s200_s23 = smov [#allocation5]   ;;  %s147_s27 = scalar_lea.hbm %s254_s1, 256 }
  0x14   :  { %s39_s24 = sshll.u32 %s200_s23, 4  ;;  %p148_p8 = scmp.ne.s32.totalorder %s254_s1, %s147_s27  ;;  %s40_s24 = int_to_ptr.vmem [resolvable:$true] %s39_s24 }
  0x15   :  { %p151_p9 = scmp.lt.u32.totalorder %s147_s27, %s254_s1 }
  0x17   :  { %p153_p10 = pnand %p151_p9, %p148_p8 }
  0x19   :  { %156 = shalt.err (!%p153_p10)
}
  0x1a   :  { %s157_s4 = scalar_lea.vmem %s40_s24, 256  ;;  %p162_p12 = scmp.lt.s32.totalorder %s40_s24, %s40_s24 }
  0x1b   :  { %p158_p11 = scmp.ne.s32.totalorder %s40_s24, %s157_s4  ;;  %p163_p13 = scmp.lt.s32.totalorder %s157_s4, %s157_s4 }
  0x1d   :  { %p164_p0 = por %p163_p13, %p162_p12 }
  0x1f   :  { %p165_p1 = pnand %p164_p0, %p158_p11 }
  0x21   :  { %168 = shalt.err (!%p165_p1)
}
  0x22   :  { %45 = dma.hbm_to_vmem [thread:$0]  %s254_s1, 256, %s40_s24, [#allocation6], %s198_s19, %s198_s19, %s199_s20  }
  0x23   :  { %191 = dma.done.wait [#allocation3], 256  }
  0x24   :  { %192 = vsyncadd [#allocation3], 4294967040 }
  0x25   :  { %193 = dma.done.wait [#allocation6], 256  }
  0x26   :  { %194 = vsyncadd [#allocation6], 4294967040  ;;  %v65_v0 = vld [vmem:[#allocation2] sm:$0xff]  ;;  %v66_v1 = vld [vmem:[#allocation2 + $0x8] sm:$0xff]  ;;  %s201_s1 = smov [#allocation7]  }
  0x27   :  { %v67_v2 = vld [vmem:[#allocation5] sm:$0xff]  ;;  %v68_v3 = vld [vmem:[#allocation5 + $0x8] sm:$0xff]  ;;  %s101_s6 = sshll.u32 %s201_s1, 4  ;;  %s102_s6 = int_to_ptr.vmem [resolvable:$true] %s101_s6 }
  0x28   :  { %v69_v4 = vadd.f32 %v67_v2, %v65_v0  ;;  %v70_v5 = vadd.f32 %v68_v3, %v66_v1  ;;  %v85_v13 = vsub.f32 %v65_v0, %v67_v2  ;;  %v86_v15 = vsub.f32 %v66_v1, %v68_v3  ;;  %s169_s7 = scalar_lea.vmem %s102_s6, 128  ;;  %p174_p3 = scmp.lt.s32.totalorder %s102_s6, %s102_s6 }
  0x29   :  { %p170_p2 = scmp.ne.s32.totalorder %s102_s6, %s169_s7  ;;  %p175_p4 = scmp.lt.s32.totalorder %s169_s7, %s169_s7 }
  0x2a   :  { %121 = vrcp.f32 %v69_v4  ;;  %v87_v19 = vand.u32 2147483647, %v85_v13  ;;  %v88_v21 = vand.u32 2147483647, %v86_v15 }
  0x2b   :  { %123 = vrcp.f32 %v70_v5  ;;  %p176_p5 = por %p175_p4, %p174_p3 }
  0x2d   :  { %p177_p6 = pnand %p176_p5, %p170_p2 }
  0x34   :  { %v122_v6 = vpop.eup %121 }
  0x35   :  { %v124_v7 = vpop.eup %123  ;;  %v73_v8 = vmul.f32 %v122_v6, %v69_v4 }
  0x36   :  { %v74_v9 = vmul.f32 %v124_v7, %v70_v5 }
  0x37   :  { %v75_v10 = vsub.f32 2.0, %v73_v8 }
  0x38   :  { %v76_v11 = vsub.f32 2.0, %v74_v9 }
  0x39   :  { %v77_v12 = vmul.f32 %v122_v6, %v75_v10 }
  0x3a   :  { %v78_v14 = vmul.f32 %v124_v7, %v76_v11 }
  0x3b   :  { %v79_v16 = vmul.f32 %v77_v12, %v69_v4 }
  0x3c   :  { %v80_v17 = vmul.f32 %v78_v14, %v70_v5 }
  0x3d   :  { %v81_v18 = vsub.f32 2.0, %v79_v16 }
  0x3e   :  { %v82_v20 = vsub.f32 2.0, %v80_v17 }
  0x3f   :  { %v83_v22 = vmul.f32 %v81_v18, %v77_v12 }
  0x40   :  { %v84_v23 = vmul.f32 %v82_v20, %v78_v14 }
  0x41   :  { %v89_v24 = vmul.f32 %v87_v19, %v83_v22 }
  0x42   :  { %v90_v25 = vmul.f32 %v88_v21, %v84_v23 }
  0x44   :  { %v92_v26 = vadd.f32 %v90_v25, %v89_v24 }
  0x46   :  { %94 = vst [vmem:[#allocation7] sm:$0xff] %v92_v26 }
  0x47   :  { %180 = shalt.err (!%p177_p6)
}
  0x48   :  { %s181_s10 = scalar_lea.hbm %s255_s2, 128 }
  0x49   :  { %p182_p7 = scmp.ne.s32.totalorder %s255_s2, %s181_s10  ;;  %p185_p8 = scmp.lt.u32.totalorder %s181_s10, %s255_s2 }
  0x4b   :  { %p187_p9 = pnand %p185_p8, %p182_p7 }
  0x4d   :  { %190 = shalt.err (!%p187_p9)
}
  0x4e   :  { %104 = dma.vmem_to_hbm [thread:$0]  %s102_s6, 128, %s255_s2, [#allocation4]  }
  0x4f   :  { %195 = dma.done.wait [#allocation4], 128  }
  0x50   :  { %196 = vsyncadd [#allocation4], 4294967168 }
  0x51   :  { %108 = vsyncpa [#allocation3], 1 }
  0x52   :  { %109 = vsyncpa [#allocation6], 1 }
  0x53   :  { %110 = vsyncpa [#allocation4], 1 }

</bundles_post_ra>
